<compile_context>
chip_gen: v6e
topology: v6e:2x2x1
jax: 0.10.0
libtpu: 0.0.40
codegen_flags: <defaults>
</compile_context>

<pallas_src>
import jax
import jax.numpy as jnp
from jax import lax
from jax.experimental import pallas as pl
from jax.experimental.pallas import tpu as pltpu

EPS = 1e-5
K = 7          # conv kernel size
PAD = 3        # conv padding


def _stacked_conv(taps, w, n):
    """One batched MXU matmul: taps (N, K*Cin, L) x w (Cout, K*Cin) -> (N, Cout, L)."""
    wb = jnp.broadcast_to(w.astype(jnp.float32)[None], (n,) + w.shape)
    return lax.dot_general(
        wb, taps,
        dimension_numbers=(((2,), (1,)), ((0,), (0,))),
        preferred_element_type=jnp.float32)


def _bn_scale_bias(y, gamma, beta):
    """Training-mode BN over (N, L) per channel, one fused sum/sumsq pass.

    Returns per-channel (scale, bias) so normalization is y*scale + bias
    (2 VPU ops / element instead of ~4).
    """
    n, _, l = y.shape
    inv_cnt = 1.0 / float(n * l)
    s = jnp.sum(y, axis=(0, 2), keepdims=True)           # (1, C, 1)
    ss = jnp.sum(y * y, axis=(0, 2), keepdims=True)      # (1, C, 1)
    mean = s * inv_cnt
    var = jnp.maximum(ss * inv_cnt - mean * mean, 0.0)   # biased var, f32 acc,
    scale = gamma * lax.rsqrt(var + EPS)                 # guard vs cancellation
    bias = beta - mean * scale
    return scale, bias


def basic_block_kernel(x_ref, w1_ref, w2_ref, g1_ref, b1_ref,
                       g2_ref, b2_ref, o_ref, t_ref, pad_ref):
    n, c, l = x_ref.shape
    cout = w1_ref.shape[0]

    # Zero the two 3-wide halo columns of the shared padded scratch ONCE;
    # they stay zero across both convs (only the interior is rewritten).
    pad_ref[:, :, :PAD] = jnp.zeros((n, c, PAD), jnp.float32)
    pad_ref[:, :, PAD + l:] = jnp.zeros((n, c, PAD), jnp.float32)

    # ---- conv1: single interior store builds the padded input, then the
    # im2col stack is written once (7 lane-window slices into aligned
    # 8-sublane blocks) and consumed by ONE batched matmul. ----
    pad_ref[:, :, PAD:PAD + l] = x_ref[...].astype(jnp.float32)
    xpad = pad_ref[...]                                   # (N, Cin, L+6) f32
    for k in range(K):                                    # static unroll
        t_ref[:, k * c:(k + 1) * c, :] = xpad[:, :, k:k + l]
    y1 = _stacked_conv(t_ref[...], w1_ref[...], n)        # (N, Cout, L) f32

    # ---- bn1 (fused scale/bias) + relu ----
    scale1, bias1 = _bn_scale_bias(y1, g1_ref[...], b1_ref[...])
    y1 = jnp.maximum(y1 * scale1 + bias1, 0.0)

    # ---- conv2: reuse BOTH scratches (halos already zero). ----
    pad_ref[:, :, PAD:PAD + l] = y1
    ypad = pad_ref[...]                                   # (N, Cout, L+6) f32
    for k in range(K):
        t_ref[:, k * cout:(k + 1) * cout, :] = ypad[:, :, k:k + l]
    y2 = _stacked_conv(t_ref[...], w2_ref[...], n)        # (N, Cout, L) f32

    # ---- bn2 + identity residual (aligned read of unpadded x) + relu ----
    scale2, bias2 = _bn_scale_bias(y2, g2_ref[...], b2_ref[...])
    out = jnp.maximum(y2 * scale2 + bias2 + x_ref[...].astype(jnp.float32), 0.0)
    o_ref[...] = out.astype(o_ref.dtype)


@jax.jit
def basic_block(x, w1_oik, w2_oik, g1, b1, g2, b2):
    """x: (N, C, L) in PyTorch NCL layout.  w*: (Cout, Cin, K) Conv1d weights.
    g*/b*: (C,) BatchNorm1d affine params.  Returns (N, C, L)."""
    n, c, l = x.shape
    cout, cin, k = w1_oik.shape
    assert k == K and cin == c and cout == c  # identity residual path (stride=1, no downsample)

    # (Cout, Cin, K) -> (Cout, K*Cin) matching the im2col stacking order, so
    # each conv is a single matmul with contraction K*Cin.
    w1s = jnp.transpose(w1_oik, (0, 2, 1)).reshape(cout, K * cin)
    w2s = jnp.transpose(w2_oik, (0, 2, 1)).reshape(cout, K * cout)

    g1r = g1.reshape(1, c, 1).astype(jnp.float32)
    b1r = b1.reshape(1, c, 1).astype(jnp.float32)
    g2r = g2.reshape(1, c, 1).astype(jnp.float32)
    b2r = b2.reshape(1, c, 1).astype(jnp.float32)

    vmem = pl.BlockSpec(memory_space=pltpu.MemorySpace.VMEM)
    return pl.pallas_call(
        basic_block_kernel,
        out_shape=jax.ShapeDtypeStruct((n, cout, l), x.dtype),
        in_specs=[vmem] * 7,
        out_specs=vmem,
        scratch_shapes=[
            pltpu.VMEM((n, K * c, l), jnp.float32),            # im2col stack (shared)
            pltpu.VMEM((n, c, l + 2 * PAD), jnp.float32),      # zero-halo pad (shared)
        ],
        compiler_params=pltpu.CompilerParams(
            vmem_limit_bytes=48 * 1024 * 1024),
    )(x, w1s, w2s, g1r, b1r, g2r, b2r)


def reference_basic_block(x, w1, w2, g1, b1, g2, b2):
    """Pure-JAX/XLA reference in PyTorch layout (NCL data, OIK weights)."""
    dn = ("NCH", "OIH", "NCH")

    def conv(v, w):
        return lax.conv_general_dilated(v, w, window_strides=(1,),
                                        padding=((PAD, PAD),),
                                        dimension_numbers=dn,
                                        precision=lax.Precision.HIGHEST)

    def bn(y, gamma, beta):
        mean = jnp.mean(y, axis=(0, 2), keepdims=True)
        var = jnp.mean((y - mean) ** 2, axis=(0, 2), keepdims=True)
        return ((y - mean) * lax.rsqrt(var + EPS) * gamma.reshape(1, -1, 1)
                + beta.reshape(1, -1, 1))

    y = jnp.maximum(bn(conv(x, w1), g1, b1), 0.0)
    y = bn(conv(y, w2), g2, b2)
    return jnp.maximum(y + x, 0.0)


if __name__ == "__main__":
    N, C, L = 2, 8, 16   # batch, channels (in == out for identity residual), length
    key = jax.random.PRNGKey(0)
    kx, k1, k2, kg1, kb1, kg2, kb2 = jax.random.split(key, 7)

    x = jax.random.normal(kx, (N, C, L), dtype=jnp.float32)

    # PyTorch Conv1d weight layout: (Cout, Cin, K).
    w1 = 0.1 * jax.random.normal(k1, (C, C, K), dtype=jnp.float32)
    w2 = 0.1 * jax.random.normal(k2, (C, C, K), dtype=jnp.float32)

    # BatchNorm1d affine params (default init is gamma=1, beta=0; perturb a
    # little so the affine path is actually exercised).
    g1 = 1.0 + 0.1 * jax.random.normal(kg1, (C,), dtype=jnp.float32)
    b1 = 0.1 * jax.random.normal(kb1, (C,), dtype=jnp.float32)
    g2 = 1.0 + 0.1 * jax.random.normal(kg2, (C,), dtype=jnp.float32)
    b2 = 0.1 * jax.random.normal(kb2, (C,), dtype=jnp.float32)

    out = jax.block_until_ready(basic_block(x, w1, w2, g1, b1, g2, b2))
    ref = jax.block_until_ready(reference_basic_block(x, w1, w2, g1, b1, g2, b2))

    assert out.shape == (N, C, L)
    max_err = float(jnp.max(jnp.abs(out - ref)))
    assert jnp.allclose(out, ref, atol=2e-3, rtol=2e-3), max_err

    print("KERNEL_OK")
</pallas_src>

<mosaic_0001>
module attributes {stable_mosaic.version = 11 : i64} {
  func.func @basic_block_kernel(%arg0: memref<2x8x16xf32, #tpu.memory_space<vmem>>, %arg1: memref<8x56xf32, #tpu.memory_space<vmem>>, %arg2: memref<8x56xf32, #tpu.memory_space<vmem>>, %arg3: memref<1x8x1xf32, #tpu.memory_space<vmem>>, %arg4: memref<1x8x1xf32, #tpu.memory_space<vmem>>, %arg5: memref<1x8x1xf32, #tpu.memory_space<vmem>>, %arg6: memref<1x8x1xf32, #tpu.memory_space<vmem>>, %arg7: memref<2x8x16xf32, #tpu.memory_space<vmem>>, %arg8: memref<2x56x16xf32, #tpu.memory_space<vmem>>, %arg9: memref<2x8x22xf32, #tpu.memory_space<vmem>>) attributes {dimension_semantics = [], scalar_prefetch = 0 : i64, scratch_operands = 2 : i64, tpu.core_type = #tpu.core_type<tc>} {
    %cst = arith.constant 0.000000e+00 : f32
    %0 = vector.broadcast %cst : f32 to vector<2x8x3xf32>
    %c0 = arith.constant 0 : index
    %c0_0 = arith.constant 0 : index
    %c0_1 = arith.constant 0 : index
    %1 = vector.load %arg9[%c0, %c0_0, %c0_1] : memref<2x8x22xf32, #tpu.memory_space<vmem>>, vector<2x8x3xf32>
    tpu.vector_store %arg9[%c0, %c0_0, %c0_1], %0 {strides = array<i32>} : memref<2x8x22xf32, #tpu.memory_space<vmem>>, vector<2x8x3xf32>,
    %cst_2 = arith.constant 0.000000e+00 : f32
    %2 = vector.broadcast %cst_2 : f32 to vector<2x8x3xf32>
    %c0_3 = arith.constant 0 : index
    %c0_4 = arith.constant 0 : index
    %c19 = arith.constant 19 : index
    %3 = vector.load %arg9[%c0_3, %c0_4, %c19] : memref<2x8x22xf32, #tpu.memory_space<vmem>>, vector<2x8x3xf32>
    tpu.vector_store %arg9[%c0_3, %c0_4, %c19], %2 {strides = array<i32>} : memref<2x8x22xf32, #tpu.memory_space<vmem>>, vector<2x8x3xf32>,
    %c0_5 = arith.constant 0 : index
    %c0_6 = arith.constant 0 : index
    %c0_7 = arith.constant 0 : index
    %4 = vector.load %arg0[%c0_5, %c0_6, %c0_7] : memref<2x8x16xf32, #tpu.memory_space<vmem>>, vector<2x8x16xf32>
    %c0_8 = arith.constant 0 : index
    %c0_9 = arith.constant 0 : index
    %c3 = arith.constant 3 : index
    %5 = vector.load %arg9[%c0_8, %c0_9, %c3] : memref<2x8x22xf32, #tpu.memory_space<vmem>>, vector<2x8x16xf32>
    tpu.vector_store %arg9[%c0_8, %c0_9, %c3], %4 {strides = array<i32>} : memref<2x8x22xf32, #tpu.memory_space<vmem>>, vector<2x8x16xf32>,
    %c0_10 = arith.constant 0 : index
    %c0_11 = arith.constant 0 : index
    %c0_12 = arith.constant 0 : index
    %6 = vector.load %arg9[%c0_10, %c0_11, %c0_12] : memref<2x8x22xf32, #tpu.memory_space<vmem>>, vector<2x8x22xf32>
    %7 = vector.extract_strided_slice %6 {offsets = [0, 0, 0], sizes = [2, 8, 16], strides = [1, 1, 1]} : vector<2x8x22xf32> to vector<2x8x16xf32>
    %c0_13 = arith.constant 0 : index
    %c0_14 = arith.constant 0 : index
    %c0_15 = arith.constant 0 : index
    %8 = vector.load %arg8[%c0_13, %c0_14, %c0_15] : memref<2x56x16xf32, #tpu.memory_space<vmem>>, vector<2x8x16xf32>
    tpu.vector_store %arg8[%c0_13, %c0_14, %c0_15], %7 {strides = array<i32>} : memref<2x56x16xf32, #tpu.memory_space<vmem>>, vector<2x8x16xf32>,
    %9 = vector.extract_strided_slice %6 {offsets = [0, 0, 1], sizes = [2, 8, 16], strides = [1, 1, 1]} : vector<2x8x22xf32> to vector<2x8x16xf32>
    %c0_16 = arith.constant 0 : index
    %c8 = arith.constant 8 : index
    %c0_17 = arith.constant 0 : index
    %10 = vector.load %arg8[%c0_16, %c8, %c0_17] : memref<2x56x16xf32, #tpu.memory_space<vmem>>, vector<2x8x16xf32>
    tpu.vector_store %arg8[%c0_16, %c8, %c0_17], %9 {strides = array<i32>} : memref<2x56x16xf32, #tpu.memory_space<vmem>>, vector<2x8x16xf32>,
    %11 = vector.extract_strided_slice %6 {offsets = [0, 0, 2], sizes = [2, 8, 16], strides = [1, 1, 1]} : vector<2x8x22xf32> to vector<2x8x16xf32>
    %c0_18 = arith.constant 0 : index
    %c16 = arith.constant 16 : index
    %c0_19 = arith.constant 0 : index
    %12 = vector.load %arg8[%c0_18, %c16, %c0_19] : memref<2x56x16xf32, #tpu.memory_space<vmem>>, vector<2x8x16xf32>
    tpu.vector_store %arg8[%c0_18, %c16, %c0_19], %11 {strides = array<i32>} : memref<2x56x16xf32, #tpu.memory_space<vmem>>, vector<2x8x16xf32>,
    %13 = vector.extract_strided_slice %6 {offsets = [0, 0, 3], sizes = [2, 8, 16], strides = [1, 1, 1]} : vector<2x8x22xf32> to vector<2x8x16xf32>
    %c0_20 = arith.constant 0 : index
    %c24 = arith.constant 24 : index
    %c0_21 = arith.constant 0 : index
    %14 = vector.load %arg8[%c0_20, %c24, %c0_21] : memref<2x56x16xf32, #tpu.memory_space<vmem>>, vector<2x8x16xf32>
    tpu.vector_store %arg8[%c0_20, %c24, %c0_21], %13 {strides = array<i32>} : memref<2x56x16xf32, #tpu.memory_space<vmem>>, vector<2x8x16xf32>,
    %15 = vector.extract_strided_slice %6 {offsets = [0, 0, 4], sizes = [2, 8, 16], strides = [1, 1, 1]} : vector<2x8x22xf32> to vector<2x8x16xf32>
    %c0_22 = arith.constant 0 : index
    %c32 = arith.constant 32 : index
    %c0_23 = arith.constant 0 : index
    %16 = vector.load %arg8[%c0_22, %c32, %c0_23] : memref<2x56x16xf32, #tpu.memory_space<vmem>>, vector<2x8x16xf32>
    tpu.vector_store %arg8[%c0_22, %c32, %c0_23], %15 {strides = array<i32>} : memref<2x56x16xf32, #tpu.memory_space<vmem>>, vector<2x8x16xf32>,
    %17 = vector.extract_strided_slice %6 {offsets = [0, 0, 5], sizes = [2, 8, 16], strides = [1, 1, 1]} : vector<2x8x22xf32> to vector<2x8x16xf32>
    %c0_24 = arith.constant 0 : index
    %c40 = arith.constant 40 : index
    %c0_25 = arith.constant 0 : index
    %18 = vector.load %arg8[%c0_24, %c40, %c0_25] : memref<2x56x16xf32, #tpu.memory_space<vmem>>, vector<2x8x16xf32>
    tpu.vector_store %arg8[%c0_24, %c40, %c0_25], %17 {strides = array<i32>} : memref<2x56x16xf32, #tpu.memory_space<vmem>>, vector<2x8x16xf32>,
    %19 = vector.extract_strided_slice %6 {offsets = [0, 0, 6], sizes = [2, 8, 16], strides = [1, 1, 1]} : vector<2x8x22xf32> to vector<2x8x16xf32>
    %c0_26 = arith.constant 0 : index
    %c48 = arith.constant 48 : index
    %c0_27 = arith.constant 0 : index
    %20 = vector.load %arg8[%c0_26, %c48, %c0_27] : memref<2x56x16xf32, #tpu.memory_space<vmem>>, vector<2x8x16xf32>
    tpu.vector_store %arg8[%c0_26, %c48, %c0_27], %19 {strides = array<i32>} : memref<2x56x16xf32, #tpu.memory_space<vmem>>, vector<2x8x16xf32>,
    %c0_28 = arith.constant 0 : index
    %c0_29 = arith.constant 0 : index
    %c0_30 = arith.constant 0 : index
    %21 = vector.load %arg8[%c0_28, %c0_29, %c0_30] : memref<2x56x16xf32, #tpu.memory_space<vmem>>, vector<2x56x16xf32>
    %c0_31 = arith.constant 0 : index
    %c0_32 = arith.constant 0 : index
    %22 = vector.load %arg1[%c0_31, %c0_32] : memref<8x56xf32, #tpu.memory_space<vmem>>, vector<8x56xf32>
    %23 = vector.shape_cast %22 : vector<8x56xf32> to vector<1x8x56xf32>
    %24 = vector.shape_cast %23 : vector<1x8x56xf32> to vector<1x8x56xf32>
    %25 = vector.broadcast %24 : vector<1x8x56xf32> to vector<2x8x56xf32>
    %cst_33 = arith.constant dense<0.000000e+00> : vector<2x8x16xf32>
    %26 = tpu.matmul %25, %21, %cst_33 {dimension_numbers = #tpu.dot_dimension_numbers<[2], [1], [1], [2], [0, 0, 0, 1, 1, 2], [0], [0]>} : vector<2x8x56xf32>, vector<2x56x16xf32>, vector<2x8x16xf32> -> vector<2x8x16xf32>
    %c0_34 = arith.constant 0 : index
    %c0_35 = arith.constant 0 : index
    %c0_36 = arith.constant 0 : index
    %27 = vector.load %arg3[%c0_34, %c0_35, %c0_36] : memref<1x8x1xf32, #tpu.memory_space<vmem>>, vector<1x8x1xf32>
    %c0_37 = arith.constant 0 : index
    %c0_38 = arith.constant 0 : index
    %c0_39 = arith.constant 0 : index
    %28 = vector.load %arg4[%c0_37, %c0_38, %c0_39] : memref<1x8x1xf32, #tpu.memory_space<vmem>>, vector<1x8x1xf32>
    %cst_40 = arith.constant dense<0.000000e+00> : vector<8xf32>
    %29 = vector.multi_reduction <add>, %26, %cst_40 [0, 2] : vector<2x8x16xf32> to vector<8xf32>
    %30 = vector.shape_cast %29 : vector<8xf32> to vector<1x8x1xf32>
    %31 = arith.mulf %26, %26 : vector<2x8x16xf32>
    %cst_41 = arith.constant dense<0.000000e+00> : vector<8xf32>
    %32 = vector.multi_reduction <add>, %31, %cst_41 [0, 2] : vector<2x8x16xf32> to vector<8xf32>
    %33 = vector.shape_cast %32 : vector<8xf32> to vector<1x8x1xf32>
    %cst_42 = arith.constant 3.125000e-02 : f32
    %34 = vector.broadcast %cst_42 : f32 to vector<1x8x1xf32>
    %35 = arith.mulf %30, %34 : vector<1x8x1xf32>
    %cst_43 = arith.constant 3.125000e-02 : f32
    %36 = vector.broadcast %cst_43 : f32 to vector<1x8x1xf32>
    %37 = arith.mulf %33, %36 : vector<1x8x1xf32>
    %38 = arith.mulf %35, %35 : vector<1x8x1xf32>
    %39 = arith.subf %37, %38 : vector<1x8x1xf32>
    %cst_44 = arith.constant 0.000000e+00 : f32
    %40 = vector.broadcast %cst_44 : f32 to vector<1x8x1xf32>
    %41 = arith.maximumf %39, %40 : vector<1x8x1xf32>
    %cst_45 = arith.constant 9.99999974E-6 : f32
    %42 = vector.broadcast %cst_45 : f32 to vector<1x8x1xf32>
    %43 = arith.addf %41, %42 : vector<1x8x1xf32>
    %44 = math.rsqrt %43 : vector<1x8x1xf32>
    %45 = arith.mulf %27, %44 : vector<1x8x1xf32>
    %46 = arith.mulf %35, %45 : vector<1x8x1xf32>
    %47 = arith.subf %28, %46 : vector<1x8x1xf32>
    %48 = vector.broadcast %45 : vector<1x8x1xf32> to vector<2x8x16xf32>
    %49 = arith.mulf %26, %48 : vector<2x8x16xf32>
    %50 = vector.broadcast %47 : vector<1x8x1xf32> to vector<2x8x16xf32>
    %51 = arith.addf %49, %50 : vector<2x8x16xf32>
    %cst_46 = arith.constant 0.000000e+00 : f32
    %52 = vector.broadcast %cst_46 : f32 to vector<2x8x16xf32>
    %53 = arith.maximumf %51, %52 : vector<2x8x16xf32>
    %c0_47 = arith.constant 0 : index
    %c0_48 = arith.constant 0 : index
    %c3_49 = arith.constant 3 : index
    %54 = vector.load %arg9[%c0_47, %c0_48, %c3_49] : memref<2x8x22xf32, #tpu.memory_space<vmem>>, vector<2x8x16xf32>
    tpu.vector_store %arg9[%c0_47, %c0_48, %c3_49], %53 {strides = array<i32>} : memref<2x8x22xf32, #tpu.memory_space<vmem>>, vector<2x8x16xf32>,
    %c0_50 = arith.constant 0 : index
    %c0_51 = arith.constant 0 : index
    %c0_52 = arith.constant 0 : index
    %55 = vector.load %arg9[%c0_50, %c0_51, %c0_52] : memref<2x8x22xf32, #tpu.memory_space<vmem>>, vector<2x8x22xf32>
    %56 = vector.extract_strided_slice %55 {offsets = [0, 0, 0], sizes = [2, 8, 16], strides = [1, 1, 1]} : vector<2x8x22xf32> to vector<2x8x16xf32>
    %c0_53 = arith.constant 0 : index
    %c0_54 = arith.constant 0 : index
    %c0_55 = arith.constant 0 : index
    %57 = vector.load %arg8[%c0_53, %c0_54, %c0_55] : memref<2x56x16xf32, #tpu.memory_space<vmem>>, vector<2x8x16xf32>
    tpu.vector_store %arg8[%c0_53, %c0_54, %c0_55], %56 {strides = array<i32>} : memref<2x56x16xf32, #tpu.memory_space<vmem>>, vector<2x8x16xf32>,
    %58 = vector.extract_strided_slice %55 {offsets = [0, 0, 1], sizes = [2, 8, 16], strides = [1, 1, 1]} : vector<2x8x22xf32> to vector<2x8x16xf32>
    %c0_56 = arith.constant 0 : index
    %c8_57 = arith.constant 8 : index
    %c0_58 = arith.constant 0 : index
    %59 = vector.load %arg8[%c0_56, %c8_57, %c0_58] : memref<2x56x16xf32, #tpu.memory_space<vmem>>, vector<2x8x16xf32>
    tpu.vector_store %arg8[%c0_56, %c8_57, %c0_58], %58 {strides = array<i32>} : memref<2x56x16xf32, #tpu.memory_space<vmem>>, vector<2x8x16xf32>,
    %60 = vector.extract_strided_slice %55 {offsets = [0, 0, 2], sizes = [2, 8, 16], strides = [1, 1, 1]} : vector<2x8x22xf32> to vector<2x8x16xf32>
    %c0_59 = arith.constant 0 : index
    %c16_60 = arith.constant 16 : index
    %c0_61 = arith.constant 0 : index
    %61 = vector.load %arg8[%c0_59, %c16_60, %c0_61] : memref<2x56x16xf32, #tpu.memory_space<vmem>>, vector<2x8x16xf32>
    tpu.vector_store %arg8[%c0_59, %c16_60, %c0_61], %60 {strides = array<i32>} : memref<2x56x16xf32, #tpu.memory_space<vmem>>, vector<2x8x16xf32>,
    %62 = vector.extract_strided_slice %55 {offsets = [0, 0, 3], sizes = [2, 8, 16], strides = [1, 1, 1]} : vector<2x8x22xf32> to vector<2x8x16xf32>
    %c0_62 = arith.constant 0 : index
    %c24_63 = arith.constant 24 : index
    %c0_64 = arith.constant 0 : index
    %63 = vector.load %arg8[%c0_62, %c24_63, %c0_64] : memref<2x56x16xf32, #tpu.memory_space<vmem>>, vector<2x8x16xf32>
    tpu.vector_store %arg8[%c0_62, %c24_63, %c0_64], %62 {strides = array<i32>} : memref<2x56x16xf32, #tpu.memory_space<vmem>>, vector<2x8x16xf32>,
    %64 = vector.extract_strided_slice %55 {offsets = [0, 0, 4], sizes = [2, 8, 16], strides = [1, 1, 1]} : vector<2x8x22xf32> to vector<2x8x16xf32>
    %c0_65 = arith.constant 0 : index
    %c32_66 = arith.constant 32 : index
    %c0_67 = arith.constant 0 : index
    %65 = vector.load %arg8[%c0_65, %c32_66, %c0_67] : memref<2x56x16xf32, #tpu.memory_space<vmem>>, vector<2x8x16xf32>
    tpu.vector_store %arg8[%c0_65, %c32_66, %c0_67], %64 {strides = array<i32>} : memref<2x56x16xf32, #tpu.memory_space<vmem>>, vector<2x8x16xf32>,
    %66 = vector.extract_strided_slice %55 {offsets = [0, 0, 5], sizes = [2, 8, 16], strides = [1, 1, 1]} : vector<2x8x22xf32> to vector<2x8x16xf32>
    %c0_68 = arith.constant 0 : index
    %c40_69 = arith.constant 40 : index
    %c0_70 = arith.constant 0 : index
    %67 = vector.load %arg8[%c0_68, %c40_69, %c0_70] : memref<2x56x16xf32, #tpu.memory_space<vmem>>, vector<2x8x16xf32>
    tpu.vector_store %arg8[%c0_68, %c40_69, %c0_70], %66 {strides = array<i32>} : memref<2x56x16xf32, #tpu.memory_space<vmem>>, vector<2x8x16xf32>,
    %68 = vector.extract_strided_slice %55 {offsets = [0, 0, 6], sizes = [2, 8, 16], strides = [1, 1, 1]} : vector<2x8x22xf32> to vector<2x8x16xf32>
    %c0_71 = arith.constant 0 : index
    %c48_72 = arith.constant 48 : index
    %c0_73 = arith.constant 0 : index
    %69 = vector.load %arg8[%c0_71, %c48_72, %c0_73] : memref<2x56x16xf32, #tpu.memory_space<vmem>>, vector<2x8x16xf32>
    tpu.vector_store %arg8[%c0_71, %c48_72, %c0_73], %68 {strides = array<i32>} : memref<2x56x16xf32, #tpu.memory_space<vmem>>, vector<2x8x16xf32>,
    %c0_74 = arith.constant 0 : index
    %c0_75 = arith.constant 0 : index
    %c0_76 = arith.constant 0 : index
    %70 = vector.load %arg8[%c0_74, %c0_75, %c0_76] : memref<2x56x16xf32, #tpu.memory_space<vmem>>, vector<2x56x16xf32>
    %c0_77 = arith.constant 0 : index
    %c0_78 = arith.constant 0 : index
    %71 = vector.load %arg2[%c0_77, %c0_78] : memref<8x56xf32, #tpu.memory_space<vmem>>, vector<8x56xf32>
    %72 = vector.shape_cast %71 : vector<8x56xf32> to vector<1x8x56xf32>
    %73 = vector.shape_cast %72 : vector<1x8x56xf32> to vector<1x8x56xf32>
    %74 = vector.broadcast %73 : vector<1x8x56xf32> to vector<2x8x56xf32>
    %cst_79 = arith.constant dense<0.000000e+00> : vector<2x8x16xf32>
    %75 = tpu.matmul %74, %70, %cst_79 {dimension_numbers = #tpu.dot_dimension_numbers<[2], [1], [1], [2], [0, 0, 0, 1, 1, 2], [0], [0]>} : vector<2x8x56xf32>, vector<2x56x16xf32>, vector<2x8x16xf32> -> vector<2x8x16xf32>
    %c0_80 = arith.constant 0 : index
    %c0_81 = arith.constant 0 : index
    %c0_82 = arith.constant 0 : index
    %76 = vector.load %arg5[%c0_80, %c0_81, %c0_82] : memref<1x8x1xf32, #tpu.memory_space<vmem>>, vector<1x8x1xf32>
    %c0_83 = arith.constant 0 : index
    %c0_84 = arith.constant 0 : index
    %c0_85 = arith.constant 0 : index
    %77 = vector.load %arg6[%c0_83, %c0_84, %c0_85] : memref<1x8x1xf32, #tpu.memory_space<vmem>>, vector<1x8x1xf32>
    %cst_86 = arith.constant dense<0.000000e+00> : vector<8xf32>
    %78 = vector.multi_reduction <add>, %75, %cst_86 [0, 2] : vector<2x8x16xf32> to vector<8xf32>
    %79 = vector.shape_cast %78 : vector<8xf32> to vector<1x8x1xf32>
    %80 = arith.mulf %75, %75 : vector<2x8x16xf32>
    %cst_87 = arith.constant dense<0.000000e+00> : vector<8xf32>
    %81 = vector.multi_reduction <add>, %80, %cst_87 [0, 2] : vector<2x8x16xf32> to vector<8xf32>
    %82 = vector.shape_cast %81 : vector<8xf32> to vector<1x8x1xf32>
    %cst_88 = arith.constant 3.125000e-02 : f32
    %83 = vector.broadcast %cst_88 : f32 to vector<1x8x1xf32>
    %84 = arith.mulf %79, %83 : vector<1x8x1xf32>
    %cst_89 = arith.constant 3.125000e-02 : f32
    %85 = vector.broadcast %cst_89 : f32 to vector<1x8x1xf32>
    %86 = arith.mulf %82, %85 : vector<1x8x1xf32>
    %87 = arith.mulf %84, %84 : vector<1x8x1xf32>
    %88 = arith.subf %86, %87 : vector<1x8x1xf32>
    %cst_90 = arith.constant 0.000000e+00 : f32
    %89 = vector.broadcast %cst_90 : f32 to vector<1x8x1xf32>
    %90 = arith.maximumf %88, %89 : vector<1x8x1xf32>
    %cst_91 = arith.constant 9.99999974E-6 : f32
    %91 = vector.broadcast %cst_91 : f32 to vector<1x8x1xf32>
    %92 = arith.addf %90, %91 : vector<1x8x1xf32>
    %93 = math.rsqrt %92 : vector<1x8x1xf32>
    %94 = arith.mulf %76, %93 : vector<1x8x1xf32>
    %95 = arith.mulf %84, %94 : vector<1x8x1xf32>
    %96 = arith.subf %77, %95 : vector<1x8x1xf32>
    %97 = vector.broadcast %94 : vector<1x8x1xf32> to vector<2x8x16xf32>
    %98 = arith.mulf %75, %97 : vector<2x8x16xf32>
    %99 = vector.broadcast %96 : vector<1x8x1xf32> to vector<2x8x16xf32>
    %100 = arith.addf %98, %99 : vector<2x8x16xf32>
    %c0_92 = arith.constant 0 : index
    %c0_93 = arith.constant 0 : index
    %c0_94 = arith.constant 0 : index
    %101 = vector.load %arg0[%c0_92, %c0_93, %c0_94] : memref<2x8x16xf32, #tpu.memory_space<vmem>>, vector<2x8x16xf32>
    %102 = arith.addf %100, %101 : vector<2x8x16xf32>
    %cst_95 = arith.constant 0.000000e+00 : f32
    %103 = vector.broadcast %cst_95 : f32 to vector<2x8x16xf32>
    %104 = arith.maximumf %102, %103 : vector<2x8x16xf32>
    %c0_96 = arith.constant 0 : index
    %c0_97 = arith.constant 0 : index
    %c0_98 = arith.constant 0 : index
    %105 = vector.load %arg7[%c0_96, %c0_97, %c0_98] : memref<2x8x16xf32, #tpu.memory_space<vmem>>, vector<2x8x16xf32>
    tpu.vector_store %arg7[%c0_96, %c0_97, %c0_98], %104 {strides = array<i32>} : memref<2x8x16xf32, #tpu.memory_space<vmem>>, vector<2x8x16xf32>,
    return
  }
}

</mosaic_0001>

<bundles_post_ra>
// kernel: basic_block.1
= control target key start
LH: loop header
LB: loop body
LE: loop exit
PB: predicated region body
PF: predicated region fallthrough
CT: control target
= control target key end

     0   :  { %vm27_vm0 = vcmask 23552   ;;  %s729_s26 = smov 3   ;;  %v730_v1 = vmov 0.0   ;;  %vm30_vm1 = vcmask 179352   ;;  %s931_s0 = inlined_call_operand.vmem [shape: f32[2,8,16], index: 0, kind: input, shape index: {}]   ;;  %s932_s1 = inlined_call_operand.vmem [shape: f32[8,56], index: 1, kind: input, shape index: {}]   ;;  %s933_s2 = inlined_call_operand.vmem [shape: f32[8,56], index: 2, kind: input, shape index: {}]   ;;  %s934_s3 = inlined_call_operand.vmem [shape: f32[1,8,1], index: 3, kind: input, shape index: {}]   ;;  %s935_s4 = inlined_call_operand.vmem [shape: f32[1,8,1], index: 4, kind: input, shape index: {}]   ;;  %s936_s5 = inlined_call_operand.vmem [shape: f32[1,8,1], index: 5, kind: input, shape index: {}]   ;;  %s937_s6 = inlined_call_operand.vmem [shape: f32[1,8,1], index: 6, kind: input, shape index: {}]   ;;  %s938_s7 = inlined_call_operand.hbm [shape: f32[2,8,16], index: 7, kind: output, shape index: {}]  }
   0x1   :  { %v785_v0 = vld [vmem:[%s931_s0] sm:$0xff]  ;;  %28 = vst.msk [vmem:[#allocation3] sm:$0xff] %vm27_vm0, %v730_v1  ;;  %29 = vst.msk [vmem:[#allocation3 + $0x8] sm:$0xff] %vm27_vm0, %v730_v1  ;;  %620 = vmatprep.subr.mxu0 %v730_v1 }
   0x2   :  { %37 = vrot.lane.b32.xlu0 %v785_v0, %s729_s26 }
   0x3   :  { %12 = vsyncpa [#allocation5], 0  ;;  %v795_v2 = vld [vmem:[%s931_s0 + $0x8] sm:$0xff]  ;;  %31 = vst.msk [vmem:[#allocation3] sm:$0xff] %vm30_vm1, %v730_v1  ;;  %637 = vmatprep.subr.mxu1 %v730_v1  ;;  %vm43_vm2 = vcmask 154648   ;;  %vm48_vm3 = vcmask 130048  }
   0x4   :  { %32 = vst.msk [vmem:[#allocation3 + $0x8] sm:$0xff] %vm30_vm1, %v730_v1  ;;  %s731_s0 = smov 123   ;;  %s732_s29 = smov 122   ;;  %vm737_vm4 = vmmov 0   ;;  %v115_v29 = vld [vmem:[%s932_s1] sm:$0xff]  ;;  %vm116_vm5 = vcmask 457728  }
   0x5   :  { %s733_s30 = smov 124   ;;  %s734_s8 = smov 125   ;;  %634 = vmatprep.mubr.msk.f32.mxu0 %vm737_vm4, %v730_v1  ;;  %651 = vmatprep.mubr.msk.f32.mxu1 %vm737_vm4, %v730_v1  ;;  %v738_v46 = vmov 0   ;;  %v260_v55 = vld [vmem:[%s934_s3] sm:$0xff] }
   0x6   :  { %39 = vrot.lane.b32.xlu0 %v795_v2, %s729_s26  ;;  %s735_s9 = smov 126   ;;  %s736_s10 = smov 127   ;;  %702 = vset.pattern.permute.xlu1 %v738_v46  ;;  %v261_v58 = vld [vmem:[%s935_s4] sm:$0xff] }
   0x7   :  { %701 = vset.pattern.permute.xlu0 %v738_v46  ;;  %s739_s19 = smov [#allocation4]  }
   0x8   :  { %s573_s20 = sshll.u32 %s739_s19, 4  ;;  %s574_s20 = int_to_ptr.vmem [resolvable:$true] %s573_s20 }
   0x9   :  { %p712_p1 = scmp.lt.s32.totalorder %s574_s20, %s574_s20 }
  0x74   :  { %v38_v3 = vpop.permute.xlu0 %37 }
  0x75   :  { %44 = vst.msk [vmem:[#allocation3] sm:$0xff] %vm43_vm2, %v38_v3 }
  0x78   :  { %v40_v4 = vpop.permute.xlu0 %39 }
  0x79   :  { %45 = vst.msk [vmem:[#allocation3 + $0x8] sm:$0xff] %vm43_vm2, %v40_v4 }
  0x7c   :  { %v46_v5 = vld [vmem:[#allocation3] sm:$0xff] }
  0x7d   :  { %85 = vrot.lane.b32.xlu0 %v46_v5, %s731_s0  ;;  %49 = vst.msk [vmem:[#allocation2] sm:$0xff] %vm48_vm3, %v46_v5  ;;  %93 = vrot.lane.b32.xlu1 %v46_v5, %s732_s29 }
  0x80   :  { %v47_v6 = vld [vmem:[#allocation3 + $0x8] sm:$0xff] }
  0x81   :  { %77 = vrot.lane.b32.xlu0 %v46_v5, %s733_s30  ;;  %50 = vst.msk [vmem:[#allocation2 + $0x38] sm:$0xff] %vm48_vm3, %v47_v6  ;;  %95 = vrot.lane.b32.xlu1 %v47_v6, %s732_s29 }
  0x84   :  { %v101_v30 = vld [vmem:[#allocation2] sm:$0xff] }
  0x85   :  { %69 = vrot.lane.b32.xlu0 %v46_v5, %s734_s8  ;;  %87 = vrot.lane.b32.xlu1 %v47_v6, %s731_s0 }
  0x88   :  { %v108_v33 = vld [vmem:[#allocation2 + $0x38] sm:$0xff] }
  0x89   :  { %61 = vrot.lane.b32.xlu0 %v46_v5, %s735_s9  ;;  %79 = vrot.lane.b32.xlu1 %v47_v6, %s733_s30 }
  0x8d   :  { %53 = vrot.lane.b32.xlu0 %v46_v5, %s736_s10  ;;  %71 = vrot.lane.b32.xlu1 %v47_v6, %s734_s8 }
  0x91   :  { %63 = vrot.lane.b32.xlu1 %v47_v6, %s735_s9 }
  0x95   :  { %55 = vrot.lane.b32.xlu1 %v47_v6, %s736_s10 }
  0xef   :  { %v86_v7 = vpop.permute.xlu0 %85  ;;  %v94_v8 = vpop.permute.xlu1 %93 }
  0xf0   :  { %91 = vst.msk [vmem:[#allocation2 + $0x28] sm:$0xff] %vm48_vm3, %v86_v7  ;;  %99 = vst.msk [vmem:[#allocation2 + $0x30] sm:$0xff] %vm48_vm3, %v94_v8 }
  0xf3   :  { %v78_v9 = vpop.permute.xlu0 %77  ;;  %v96_v10 = vpop.permute.xlu1 %95 }
  0xf4   :  { %83 = vst.msk [vmem:[#allocation2 + $0x20] sm:$0xff] %vm48_vm3, %v78_v9  ;;  %100 = vst.msk [vmem:[#allocation2 + $0x68] sm:$0xff] %vm48_vm3, %v96_v10 }
  0xf7   :  { %v70_v11 = vpop.permute.xlu0 %69  ;;  %v88_v12 = vpop.permute.xlu1 %87  ;;  %v107_v13 = vld [vmem:[#allocation2 + $0x30] sm:$0xff]  ;;  %v106_v14 = vld [vmem:[#allocation2 + $0x28] sm:$0xff] }
  0xf8   :  { %75 = vst.msk [vmem:[#allocation2 + $0x18] sm:$0xff] %vm48_vm3, %v70_v11  ;;  %92 = vst.msk [vmem:[#allocation2 + $0x60] sm:$0xff] %vm48_vm3, %v88_v12  ;;  %621 = vmatpush3.msra.mxu0 %v107_v13 }
  0xf9   :  { %622 = vmatprep.subr.mxu0 %v730_v1 }
  0xfa   :  { %623 = vmatpush3.msra.mxu0 %v106_v14 }
  0xfb   :  { %v62_v15 = vpop.permute.xlu0 %61  ;;  %624 = vmatprep.subr.mxu0 %v730_v1  ;;  %v80_v16 = vpop.permute.xlu1 %79  ;;  %v105_v17 = vld [vmem:[#allocation2 + $0x20] sm:$0xff]  ;;  %v114_v18 = vld [vmem:[#allocation2 + $0x68] sm:$0xff] }
  0xfc   :  { %67 = vst.msk [vmem:[#allocation2 + $0x10] sm:$0xff] %vm48_vm3, %v62_v15  ;;  %84 = vst.msk [vmem:[#allocation2 + $0x58] sm:$0xff] %vm48_vm3, %v80_v16  ;;  %625 = vmatpush3.msra.mxu0 %v105_v17  ;;  %638 = vmatpush3.msra.mxu1 %v114_v18 }
  0xfd   :  { %626 = vmatprep.subr.mxu0 %v730_v1  ;;  %639 = vmatprep.subr.mxu1 %v730_v1 }
  0xff   :  { %v54_v19 = vpop.permute.xlu0 %53  ;;  %v72_v20 = vpop.permute.xlu1 %71  ;;  %v104_v21 = vld [vmem:[#allocation2 + $0x18] sm:$0xff]  ;;  %v113_v22 = vld [vmem:[#allocation2 + $0x60] sm:$0xff] }
 0x100   :  { %59 = vst.msk [vmem:[#allocation2 + $0x8] sm:$0xff] %vm48_vm3, %v54_v19  ;;  %76 = vst.msk [vmem:[#allocation2 + $0x50] sm:$0xff] %vm48_vm3, %v72_v20  ;;  %627 = vmatpush3.msra.mxu0 %v104_v21  ;;  %640 = vmatpush3.msra.mxu1 %v113_v22 }
 0x101   :  { %628 = vmatprep.subr.mxu0 %v730_v1  ;;  %641 = vmatprep.subr.mxu1 %v730_v1 }
 0x103   :  { %v64_v23 = vpop.permute.xlu1 %63  ;;  %v103_v24 = vld [vmem:[#allocation2 + $0x10] sm:$0xff]  ;;  %v112_v25 = vld [vmem:[#allocation2 + $0x58] sm:$0xff] }
 0x104   :  { %68 = vst.msk [vmem:[#allocation2 + $0x48] sm:$0xff] %vm48_vm3, %v64_v23  ;;  %629 = vmatpush3.msra.mxu0 %v103_v24  ;;  %642 = vmatpush3.msra.mxu1 %v112_v25 }
 0x105   :  { %630 = vmatprep.subr.mxu0 %v730_v1  ;;  %643 = vmatprep.subr.mxu1 %v730_v1 }
 0x107   :  { %v56_v26 = vpop.permute.xlu1 %55  ;;  %v102_v27 = vld [vmem:[#allocation2 + $0x8] sm:$0xff]  ;;  %v111_v28 = vld [vmem:[#allocation2 + $0x50] sm:$0xff] }
 0x108   :  { %60 = vst.msk [vmem:[#allocation2 + $0x40] sm:$0xff] %vm48_vm3, %v56_v26  ;;  %631 = vmatpush3.msra.mxu0 %v102_v27  ;;  %644 = vmatpush3.msra.mxu1 %v111_v28 }
 0x109   :  { %632 = vmatprep.subr.mxu0 %v730_v1  ;;  %645 = vmatprep.subr.mxu1 %v730_v1 }
 0x10a   :  { %633 = vmatpush3.msra.mxu0 %v101_v30 }
 0x10b   :  { %v110_v31 = vld [vmem:[#allocation2 + $0x48] sm:$0xff]  ;;  %635 = vmatmul.mubr.msk.f32.vlgmr.msra.gmra.mxu0 %vm116_vm5, %v115_v29  ;;  %654 = vmatprep.subr.mxu0 %v730_v1 }
 0x10c   :  { %646 = vmatpush3.msra.mxu1 %v110_v31  ;;  %668 = vmatprep.mubr.msk.f32.mxu0 %vm737_vm4, %v730_v1 }
 0x10d   :  { %647 = vmatprep.subr.mxu1 %v730_v1 }
 0x10f   :  { %v109_v32 = vld [vmem:[#allocation2 + $0x40] sm:$0xff] }
 0x110   :  { %648 = vmatpush3.msra.mxu1 %v109_v32  ;;  %v378_v32 = vld [vmem:[%s933_s2] sm:$0xff] }
 0x111   :  { %649 = vmatprep.subr.mxu1 %v730_v1 }
 0x112   :  { %650 = vmatpush3.msra.mxu1 %v108_v33 }
 0x113   :  { %652 = vmatmul.mubr.msk.f32.vlgmr.msra.gmra.mxu1 %vm116_vm5, %v115_v29  ;;  %671 = vmatprep.subr.mxu1 %v730_v1 }
 0x114   :  { %685 = vmatprep.mubr.msk.f32.mxu1 %vm737_vm4, %v730_v1 }
 0x1cb   :  { %v186_v34 = vpop.f32.mrf.mxu0 }
 0x1cc   :  { %v267_v36 = vmul.f32 %v186_v34, %v186_v34  ;;  %v262_v37 = vsel %vm48_vm3, %v186_v34, 0.0 }
 0x1cd   :  { %v636_v35 = vpop.f32.mrf.mxu0 }
 0x1ce   :  { %v269_v41 = vsel %vm48_vm3, %v267_v36, 0.0 }
 0x1d3   :  { %v256_v38 = vpop.f32.mrf.mxu1 }
 0x1d4   :  { %v268_v39 = vmul.f32 %v256_v38, %v256_v38  ;;  %v263_v40 = vsel %vm48_vm3, %v256_v38, 0.0 }
 0x1d5   :  { %v653_v42 = vpop.f32.mrf.mxu1  ;;  %v264_v43 = vadd.f32 %v263_v40, %v262_v37 }
 0x1d6   :  { %v270_v44 = vsel %vm48_vm3, %v268_v39, 0.0 }
 0x1d7   :  { %265 = vadd.xlane.f32.xlu0 %v264_v43  ;;  %v271_v45 = vadd.f32 %v270_v44, %v269_v41 }
 0x1d9   :  { %272 = vadd.xlane.f32.xlu1 %v271_v45 }
 0x260   :  { %v266_v47 = vpop.xlane.xlu0 %265 }
 0x261   :  { %v274_v48 = vmul.f32 0.03125, %v266_v47 }
 0x262   :  { %v273_v49 = vpop.xlane.xlu1 %272 }
 0x263   :  { %v276_v50 = vmul.f32 %v274_v48, %v274_v48  ;;  %v275_v51 = vmul.f32 0.03125, %v273_v49 }
 0x265   :  { %v277_v52 = vsub.f32 %v275_v51, %v276_v50 }
 0x267   :  { %v278_v53 = vmax.f32 %v277_v52, 0.0 }
 0x269   :  { %v279_v54 = vadd.f32 1e-05, %v278_v53 }
 0x26b   :  { %703 = vrsqrt.f32 %v279_v54 }
 0x278   :  { %v704_v56 = vpop.eup %703 }
 0x279   :  { %v281_v57 = vmul.f32 %v704_v56, %v260_v55 }
 0x27b   :  { %286 = vperm.xlu0 %701, %v281_v57   ;;  %v282_v59 = vmul.f32 %v281_v57, %v274_v48 }
 0x27d   :  { %v283_v60 = vsub.f32 %v261_v58, %v282_v59  ;;  %v522_v58 = vld [vmem:[%s936_s5] sm:$0xff]  ;;  %s707_s5 = scalar_lea.vmem %s574_s20, 256 }
 0x27e   :  { %p708_p0 = scmp.ne.s32.totalorder %s574_s20, %s707_s5  ;;  %p713_p2 = scmp.lt.s32.totalorder %s707_s5, %s707_s5 }
 0x27f   :  { %293 = vperm.xlu1 %702, %v283_v60  }
 0x280   :  { %p714_p3 = por %p713_p2, %p712_p1 }
 0x282   :  { %p715_p4 = pnand %p714_p3, %p708_p0 }
 0x2f6   :  { %v287_v61 = vpop.permute.xlu0 %286 }
 0x2f7   :  { %v289_v62 = vmul.f32 %v287_v61, %v186_v34  ;;  %v290_v3 = vmul.f32 %v287_v61, %v256_v38  ;;  %v523_v61 = vld [vmem:[%s937_s6] sm:$0xff] }
 0x2fa   :  { %v294_v63 = vpop.permute.xlu1 %293 }
 0x2fb   :  { %v296_v4 = vadd.f32 %v294_v63, %v289_v62  ;;  %v297_v5 = vadd.f32 %v294_v63, %v290_v3 }
 0x2fd   :  { %v298_v6 = vmax.f32 %v296_v4, 0.0  ;;  %v299_v7 = vmax.f32 %v297_v5, 0.0 }
 0x2ff   :  { %302 = vrot.lane.b32.xlu1 %v298_v6, %s729_s26 }
 0x303   :  { %304 = vrot.lane.b32.xlu1 %v299_v7, %s729_s26 }
 0x371   :  { %v303_v8 = vpop.permute.xlu1 %302 }
 0x372   :  { %308 = vst.msk [vmem:[#allocation3] sm:$0xff] %vm43_vm2, %v303_v8 }
 0x375   :  { %v305_v9 = vpop.permute.xlu1 %304 }
 0x376   :  { %309 = vst.msk [vmem:[#allocation3 + $0x8] sm:$0xff] %vm43_vm2, %v305_v9 }
 0x379   :  { %v310_v10 = vld [vmem:[#allocation3] sm:$0xff] }
 0x37a   :  { %340 = vrot.lane.b32.xlu0 %v310_v10, %s733_s30  ;;  %312 = vst.msk [vmem:[#allocation2] sm:$0xff] %vm48_vm3, %v310_v10  ;;  %356 = vrot.lane.b32.xlu1 %v310_v10, %s732_s29 }
 0x37d   :  { %v311_v11 = vld [vmem:[#allocation3 + $0x8] sm:$0xff] }
 0x37e   :  { %332 = vrot.lane.b32.xlu0 %v310_v10, %s734_s8  ;;  %358 = vrot.lane.b32.xlu1 %v311_v11, %s732_s29  ;;  %313 = vst.msk [vmem:[#allocation2 + $0x38] sm:$0xff] %vm48_vm3, %v311_v11 }
 0x381   :  { %v364_v33 = vld [vmem:[#allocation2] sm:$0xff] }
 0x382   :  { %324 = vrot.lane.b32.xlu0 %v310_v10, %s735_s9  ;;  %348 = vrot.lane.b32.xlu1 %v310_v10, %s731_s0 }
 0x385   :  { %v371_v38 = vld [vmem:[#allocation2 + $0x38] sm:$0xff] }
 0x386   :  { %316 = vrot.lane.b32.xlu0 %v310_v10, %s736_s10  ;;  %350 = vrot.lane.b32.xlu1 %v311_v11, %s731_s0 }
 0x38a   :  { %342 = vrot.lane.b32.xlu1 %v311_v11, %s733_s30 }
 0x38e   :  { %334 = vrot.lane.b32.xlu1 %v311_v11, %s734_s8 }
 0x392   :  { %326 = vrot.lane.b32.xlu1 %v311_v11, %s735_s9 }
 0x396   :  { %318 = vrot.lane.b32.xlu1 %v311_v11, %s736_s10 }
 0x3ec   :  { %v341_v12 = vpop.permute.xlu0 %340  ;;  %v357_v13 = vpop.permute.xlu1 %356 }
 0x3ed   :  { %346 = vst.msk [vmem:[#allocation2 + $0x20] sm:$0xff] %vm48_vm3, %v341_v12  ;;  %362 = vst.msk [vmem:[#allocation2 + $0x30] sm:$0xff] %vm48_vm3, %v357_v13 }
 0x3f0   :  { %v333_v14 = vpop.permute.xlu0 %332  ;;  %v359_v15 = vpop.permute.xlu1 %358 }
 0x3f1   :  { %338 = vst.msk [vmem:[#allocation2 + $0x18] sm:$0xff] %vm48_vm3, %v333_v14  ;;  %363 = vst.msk [vmem:[#allocation2 + $0x68] sm:$0xff] %vm48_vm3, %v359_v15 }
 0x3f4   :  { %v325_v16 = vpop.permute.xlu0 %324  ;;  %v349_v17 = vpop.permute.xlu1 %348  ;;  %v370_v18 = vld [vmem:[#allocation2 + $0x30] sm:$0xff]  ;;  %v368_v24 = vld [vmem:[#allocation2 + $0x20] sm:$0xff] }
 0x3f5   :  { %330 = vst.msk [vmem:[#allocation2 + $0x10] sm:$0xff] %vm48_vm3, %v325_v16  ;;  %354 = vst.msk [vmem:[#allocation2 + $0x28] sm:$0xff] %vm48_vm3, %v349_v17  ;;  %655 = vmatpush3.msra.mxu0 %v370_v18 }
 0x3f6   :  { %656 = vmatprep.subr.mxu0 %v730_v1 }
 0x3f8   :  { %v317_v19 = vpop.permute.xlu0 %316  ;;  %v351_v20 = vpop.permute.xlu1 %350  ;;  %v377_v21 = vld [vmem:[#allocation2 + $0x68] sm:$0xff]  ;;  %v367_v26 = vld [vmem:[#allocation2 + $0x18] sm:$0xff] }
 0x3f9   :  { %322 = vst.msk [vmem:[#allocation2 + $0x8] sm:$0xff] %vm48_vm3, %v317_v19  ;;  %355 = vst.msk [vmem:[#allocation2 + $0x60] sm:$0xff] %vm48_vm3, %v351_v20  ;;  %672 = vmatpush3.msra.mxu1 %v377_v21 }
 0x3fa   :  { %673 = vmatprep.subr.mxu1 %v730_v1 }
 0x3fc   :  { %v343_v22 = vpop.permute.xlu1 %342  ;;  %v369_v23 = vld [vmem:[#allocation2 + $0x28] sm:$0xff]  ;;  %v366_v28 = vld [vmem:[#allocation2 + $0x10] sm:$0xff] }
 0x3fd   :  { %347 = vst.msk [vmem:[#allocation2 + $0x58] sm:$0xff] %vm48_vm3, %v343_v22  ;;  %657 = vmatpush3.msra.mxu0 %v369_v23 }
 0x3fe   :  { %658 = vmatprep.subr.mxu0 %v730_v1 }
 0x3ff   :  { %659 = vmatpush3.msra.mxu0 %v368_v24 }
 0x400   :  { %660 = vmatprep.subr.mxu0 %v730_v1  ;;  %v335_v25 = vpop.permute.xlu1 %334  ;;  %v376_v27 = vld [vmem:[#allocation2 + $0x60] sm:$0xff]  ;;  %v365_v30 = vld [vmem:[#allocation2 + $0x8] sm:$0xff] }
 0x401   :  { %339 = vst.msk [vmem:[#allocation2 + $0x50] sm:$0xff] %vm48_vm3, %v335_v25  ;;  %661 = vmatpush3.msra.mxu0 %v367_v26  ;;  %674 = vmatpush3.msra.mxu1 %v376_v27 }
 0x402   :  { %662 = vmatprep.subr.mxu0 %v730_v1  ;;  %675 = vmatprep.subr.mxu1 %v730_v1 }
 0x403   :  { %663 = vmatpush3.msra.mxu0 %v366_v28 }
 0x404   :  { %664 = vmatprep.subr.mxu0 %v730_v1  ;;  %v327_v29 = vpop.permute.xlu1 %326  ;;  %v375_v31 = vld [vmem:[#allocation2 + $0x58] sm:$0xff] }
 0x405   :  { %331 = vst.msk [vmem:[#allocation2 + $0x48] sm:$0xff] %vm48_vm3, %v327_v29  ;;  %665 = vmatpush3.msra.mxu0 %v365_v30  ;;  %676 = vmatpush3.msra.mxu1 %v375_v31 }
 0x406   :  { %666 = vmatprep.subr.mxu0 %v730_v1  ;;  %677 = vmatprep.subr.mxu1 %v730_v1 }
 0x407   :  { %667 = vmatpush3.msra.mxu0 %v364_v33 }
 0x408   :  { %v319_v34 = vpop.permute.xlu1 %318  ;;  %v374_v35 = vld [vmem:[#allocation2 + $0x50] sm:$0xff]  ;;  %669 = vmatmul.mubr.msk.f32.vlgmr.msra.gmra.mxu0 %vm116_vm5, %v378_v32 }
 0x409   :  { %323 = vst.msk [vmem:[#allocation2 + $0x40] sm:$0xff] %vm48_vm3, %v319_v34  ;;  %678 = vmatpush3.msra.mxu1 %v374_v35 }
 0x40a   :  { %679 = vmatprep.subr.mxu1 %v730_v1 }
 0x40c   :  { %v373_v36 = vld [vmem:[#allocation2 + $0x48] sm:$0xff] }
 0x40d   :  { %680 = vmatpush3.msra.mxu1 %v373_v36 }
 0x40e   :  { %681 = vmatprep.subr.mxu1 %v730_v1 }
 0x410   :  { %v372_v37 = vld [vmem:[#allocation2 + $0x40] sm:$0xff] }
 0x411   :  { %682 = vmatpush3.msra.mxu1 %v372_v37 }
 0x412   :  { %683 = vmatprep.subr.mxu1 %v730_v1 }
 0x413   :  { %684 = vmatpush3.msra.mxu1 %v371_v38 }
 0x414   :  { %686 = vmatmul.mubr.msk.f32.vlgmr.msra.gmra.mxu1 %vm116_vm5, %v378_v32 }
 0x4c8   :  { %v448_v39 = vpop.f32.mrf.mxu0 }
 0x4c9   :  { %v529_v41 = vmul.f32 %v448_v39, %v448_v39  ;;  %v524_v42 = vsel %vm48_vm3, %v448_v39, 0.0 }
 0x4ca   :  { %v670_v40 = vpop.f32.mrf.mxu0 }
 0x4cb   :  { %v531_v46 = vsel %vm48_vm3, %v529_v41, 0.0 }
 0x4d4   :  { %v518_v43 = vpop.f32.mrf.mxu1 }
 0x4d5   :  { %v530_v44 = vmul.f32 %v518_v43, %v518_v43  ;;  %v525_v45 = vsel %vm48_vm3, %v518_v43, 0.0 }
 0x4d6   :  { %v687_v47 = vpop.f32.mrf.mxu1  ;;  %v526_v48 = vadd.f32 %v525_v45, %v524_v42 }
 0x4d7   :  { %v532_v49 = vsel %vm48_vm3, %v530_v44, 0.0 }
 0x4d8   :  { %527 = vadd.xlane.f32.xlu0 %v526_v48  ;;  %v533_v1 = vadd.f32 %v532_v49, %v531_v46 }
 0x4da   :  { %534 = vadd.xlane.f32.xlu1 %v533_v1 }
 0x561   :  { %v528_v50 = vpop.xlane.xlu0 %527 }
 0x562   :  { %v536_v51 = vmul.f32 0.03125, %v528_v50 }
 0x563   :  { %v535_v52 = vpop.xlane.xlu1 %534 }
 0x564   :  { %v538_v53 = vmul.f32 %v536_v51, %v536_v51  ;;  %v537_v54 = vmul.f32 0.03125, %v535_v52 }
 0x566   :  { %v539_v55 = vsub.f32 %v537_v54, %v538_v53 }
 0x568   :  { %v540_v56 = vmax.f32 %v539_v55, 0.0 }
 0x56a   :  { %v541_v57 = vadd.f32 1e-05, %v540_v56 }
 0x56c   :  { %705 = vrsqrt.f32 %v541_v57 }
 0x579   :  { %v706_v59 = vpop.eup %705 }
 0x57a   :  { %v543_v60 = vmul.f32 %v706_v59, %v522_v58 }
 0x57c   :  { %548 = vperm.xlu0 %701, %v543_v60   ;;  %v544_v62 = vmul.f32 %v543_v60, %v536_v51 }
 0x57e   :  { %v545_v63 = vsub.f32 %v523_v61, %v544_v62 }
 0x580   :  { %555 = vperm.xlu1 %702, %v545_v63  }
 0x5f7   :  { %v549_v3 = vpop.permute.xlu0 %548 }
 0x5f8   :  { %v551_v4 = vmul.f32 %v549_v3, %v448_v39  ;;  %v552_v5 = vmul.f32 %v549_v3, %v518_v43 }
 0x5fb   :  { %v556_v6 = vpop.permute.xlu1 %555 }
 0x5fc   :  { %v558_v7 = vadd.f32 %v556_v6, %v551_v4  ;;  %v559_v8 = vadd.f32 %v556_v6, %v552_v5 }
 0x5fe   :  { %v562_v9 = vadd.f32 %v558_v7, %v785_v0  ;;  %v563_v10 = vadd.f32 %v559_v8, %v795_v2 }
 0x600   :  { %v564_v11 = vmax.f32 %v562_v9, 0.0  ;;  %v565_v12 = vmax.f32 %v563_v10, 0.0 }
 0x602   :  { %566 = vst.msk [vmem:[#allocation4] sm:$0xff] %vm48_vm3, %v564_v11  ;;  %567 = vst.msk [vmem:[#allocation4 + $0x8] sm:$0xff] %vm48_vm3, %v565_v12 }
 0x603   :  { %718 = shalt.err (!%p715_p4)
}
 0x604   :  { %s740_s6 = smov 128   ;;  %s741_s21 = smov 8  }
 0x605   :  { %579 = dma.vmem_to_hbm [thread:$0]  %s574_s20, 256, %s938_s7, [#allocation5], %s740_s6, %s740_s6, %s741_s21  }
 0x606   :  { %727 = dma.done.wait [#allocation5], 256  }
 0x607   :  { %728 = vsyncadd [#allocation5], 4294967040 }
 0x608   :  { %583 = vsyncpa [#allocation5], 1 }

</bundles_post_ra>
